<compile_context>
chip_gen: v6e
topology: v6e:2x2x1
jax: 0.10.0
libtpu: 0.0.40
codegen_flags: <defaults>
</compile_context>

<pallas_src>
import jax
import jax.numpy as jnp
from jax import lax
from jax.experimental import pallas as pl
from jax.experimental.pallas import tpu as pltpu

HIDDEN_DIM2 = 64
_LANE = 128


def _round_up(x, m):
    return (x + m - 1) // m * m


def _pick_tiles(n):
    """Choose (n_pad, tile_m, tile_k, tile_i, tile_j) for node count n."""
    n_128 = _round_up(max(n, 1), _LANE)
    if n_128 <= 512:
        # Small graph: one tile covers everything, minimal padding.
        return n_128, n_128, n_128, n_128, n_128
    n_pad = _round_up(n, 512)

    def _largest_divisor_tile(cap):
        for t in (2048, 1024, 512):
            if t <= cap and n_pad % t == 0:
                return t
        return 512

    tile_m = 512                      # stage-1 output-row tile
    tile_k = _largest_divisor_tile(2048)  # stage-1 contraction tile
    tile_i = 512                      # stage-2 output-row tile
    tile_j = _largest_divisor_tile(2048)  # stage-2 output-col tile (lane-dense writes)
    return n_pad, tile_m, tile_k, tile_i, tile_j


# ---- Stage 1: H[i_tile] = relu(sum_k A[i_tile, k_tile] @ ZW[k_tile] + b) ------
def _h_kernel(adj_ref, zw_ref, b_ref, h_ref, acc_ref):
    @pl.when(pl.program_id(1) == 0)
    def _():
        acc_ref[...] = jnp.zeros_like(acc_ref)

    acc_ref[...] += jnp.dot(adj_ref[...], zw_ref[...],
                            preferred_element_type=jnp.float32)

    @pl.when(pl.program_id(1) == pl.num_programs(1) - 1)
    def _():
        h_ref[...] = jnp.maximum(acc_ref[...] + b_ref[...], 0.0).astype(h_ref.dtype)


# ---- Stage 2: A_hat[i_tile, j_tile] = H_i @ H_j^T (contract feature dim) ------
def _ahat_kernel(hi_ref, hj_ref, out_ref):
    out_ref[...] = lax.dot_general(
        hi_ref[...], hj_ref[...],
        dimension_numbers=(((1,), (1,)), ((), ())),
        preferred_element_type=jnp.float32,
    )


def build_gcn_norm_adjacency(edge_index, num_nodes, *, n_pad=None,
                             dtype=jnp.float32):
    """Dense symmetric-normalized adjacency with self-loops (PyG GCNConv style),
    built directly at padded size (n_pad, n_pad) in the requested dtype.

    edge_index: (2, E) int32, row 0 = source, row 1 = target.
    Padded rows/cols have degree 0 -> stay exactly zero.
    """
    if n_pad is None:
        n_pad = num_nodes
    src, dst = edge_index[0], edge_index[1]
    adj = jnp.zeros((n_pad, n_pad), jnp.float32)
    adj = adj.at[dst, src].add(1.0)
    diag = jnp.where(jnp.arange(n_pad) < num_nodes, 1.0, 0.0)  # loops on valid nodes
    adj = adj + jnp.diag(diag)
    deg = adj.sum(axis=1)
    dis = jnp.where(deg > 0, lax.rsqrt(deg), 0.0)
    return (dis[:, None] * adj * dis[None, :]).astype(dtype)


def structure_decoder_forward(z, edge_index, w, b):
    """z: (N,D) f32, edge_index: (2,E) i32, w: (D,D) f32, b: (1,D) f32 -> (N,N) f32."""
    n, d = z.shape
    n_pad, tile_m, tile_k, tile_i, tile_j = _pick_tiles(n)
    d_pad = _round_up(d, _LANE)

    # Padded bf16 adjacency built directly at (n_pad, n_pad) -> no extra pad pass.
    adj_p = build_gcn_norm_adjacency(edge_index, n, n_pad=n_pad, dtype=jnp.bfloat16)

    # Hoist Z @ W out of the hot path (a (N,64)x(64,64) GEMM is trivial for XLA).
    zw = jnp.dot(z.astype(jnp.float32), w.astype(jnp.float32),
                 preferred_element_type=jnp.float32)
    zw_p = jnp.zeros((n_pad, d_pad), jnp.bfloat16).at[:n, :d].set(
        zw.astype(jnp.bfloat16))
    b_p = jnp.zeros((1, d_pad), jnp.float32).at[:, :d].set(
        b.reshape(1, -1).astype(jnp.float32))

    gm, gk = n_pad // tile_m, n_pad // tile_k
    gi, gj = n_pad // tile_i, n_pad // tile_j

    # ---- Stage 1: H (bf16, (n_pad, d_pad)) -----------------------------------
    h = pl.pallas_call(
        _h_kernel,
        out_shape=jax.ShapeDtypeStruct((n_pad, d_pad), jnp.bfloat16),
        grid_spec=pltpu.PrefetchScalarGridSpec(
            num_scalar_prefetch=0,
            grid=(gm, gk),                       # rows parallel, K arbitrary (accum)
            in_specs=[
                pl.BlockSpec((tile_m, tile_k), lambda i, k: (i, k)),  # adjacency
                pl.BlockSpec((tile_k, d_pad), lambda i, k: (k, 0)),   # ZW K-stripe
                pl.BlockSpec((1, d_pad), lambda i, k: (0, 0)),        # bias
            ],
            out_specs=pl.BlockSpec((tile_m, d_pad), lambda i, k: (i, 0)),
            scratch_shapes=[pltpu.VMEM((tile_m, d_pad), jnp.float32)],
        ),
        compiler_params=pltpu.CompilerParams(
            dimension_semantics=("parallel", "arbitrary"),
            vmem_limit_bytes=48 << 20,           # footprint is N-independent now
        ),
        cost_estimate=pl.CostEstimate(
            flops=2 * n_pad * n_pad * d_pad,
            transcendentals=0,
            bytes_accessed=(2 * n_pad * n_pad            # adjacency read (bf16)
                            + 2 * n_pad * d_pad * gm     # ZW re-streamed per row stripe
                            + 2 * n_pad * d_pad          # H writeback (bf16)
                            + 4 * d_pad),                # bias
        ),
    )(adj_p, zw_p, b_p)

    # ---- Stage 2: A_hat = H @ H^T ---------------------------------------------
    a_hat_p = pl.pallas_call(
        _ahat_kernel,
        out_shape=jax.ShapeDtypeStruct((n_pad, n_pad), jnp.float32),
        grid_spec=pltpu.PrefetchScalarGridSpec(
            num_scalar_prefetch=0,
            grid=(gi, gj),   # i slow, j fast -> H_i block stays resident across j
            in_specs=[
                pl.BlockSpec((tile_i, d_pad), lambda i, j: (i, 0)),
                pl.BlockSpec((tile_j, d_pad), lambda i, j: (j, 0)),
            ],
            out_specs=pl.BlockSpec((tile_i, tile_j), lambda i, j: (i, j)),
        ),
        compiler_params=pltpu.CompilerParams(
            dimension_semantics=("parallel", "parallel"),
            vmem_limit_bytes=48 << 20,
        ),
        cost_estimate=pl.CostEstimate(
            flops=2 * n_pad * n_pad * d_pad,
            transcendentals=0,
            bytes_accessed=(4 * n_pad * n_pad               # f32 output write
                            + 2 * n_pad * d_pad * (gi + 1)  # H reads (bf16)
                            ),
        ),
    )(h, h)

    return a_hat_p[:n, :n]


def structure_decoder_ref(z, edge_index, w, b):
    adj = build_gcn_norm_adjacency(edge_index, z.shape[0])
    h = jnp.maximum(adj @ (z @ w) + b, 0.0)
    return h @ h.T


if __name__ == "__main__":
    key = jax.random.PRNGKey(0)
    k_z, k_w, k_b = jax.random.split(key, 3)

    N = 16                      # number of nodes (small synthetic graph)
    D = HIDDEN_DIM2             # hidden_dim2 = 64

    # Deterministic node embeddings z: (N, D)
    z = jax.random.normal(k_z, (N, D), dtype=jnp.float32)

    # Deterministic undirected ring graph edge_index: (2, 2N)
    idx = jnp.arange(N, dtype=jnp.int32)
    nxt = (idx + 1) % N
    edge_index = jnp.stack(
        [jnp.concatenate([idx, nxt]), jnp.concatenate([nxt, idx])], axis=0
    )

    # GCNConv parameters (glorot-style weight, small bias to exercise the bias path)
    limit = (6.0 / (D + D)) ** 0.5
    w = jax.random.uniform(k_w, (D, D), jnp.float32, -limit, limit)
    b = 0.01 * jax.random.normal(k_b, (1, D), dtype=jnp.float32)

    fwd = jax.jit(structure_decoder_forward)
    a_hat = fwd(z, edge_index, w, b)
    jax.block_until_ready(a_hat)

    # Sanity check against a pure-JAX f32 reference. The kernel uses bf16
    # operands with f32 accumulation, so compare max error relative to scale.
    a_ref = structure_decoder_ref(z, edge_index, w, b)
    assert a_hat.shape == (N, N)
    rel_err = jnp.max(jnp.abs(a_hat - a_ref)) / (jnp.max(jnp.abs(a_ref)) + 1e-6)
    assert rel_err < 3e-2, f"max relative error too large: {rel_err}"

    print("KERNEL_OK")
</pallas_src>

<mosaic_0001>
module attributes {stable_mosaic.version = 11 : i64} {
  func.func private @main(%arg0: i32) attributes {dimension_semantics = [#tpu.dimension_semantics<core_parallel>], iteration_bounds = array<i64: 2>, tpu.core_type = #tpu.core_type<sc_scalar_subcore>, window_params = []} {
    return
  }
}

module attributes {stable_mosaic.version = 11 : i64} {
  func.func private @main(%arg0: i32) attributes {dimension_semantics = [#tpu.dimension_semantics<core_parallel>], iteration_bounds = array<i64: 2>, tpu.core_type = #tpu.core_type<sc_scalar_subcore>, window_params = []} {
    return
  }
}

module attributes {stable_mosaic.version = 11 : i64} {
  func.func @_h_kernel(%arg0: i32, %arg1: i32, %arg2: memref<128x128xbf16, #tpu.memory_space<vmem>>, %arg3: memref<128x128xbf16, #tpu.memory_space<vmem>>, %arg4: memref<1x128xf32, #tpu.memory_space<vmem>>, %arg5: memref<128x128xbf16, #tpu.memory_space<vmem>>, %arg6: memref<128x128xf32, #tpu.memory_space<vmem>>) attributes {dimension_semantics = [#tpu.dimension_semantics<parallel>, #tpu.dimension_semantics<arbitrary>], iteration_bounds = array<i64: 1, 1>, scalar_prefetch = 0 : i64, scratch_operands = 1 : i64, tpu.core_type = #tpu.core_type<tc>, window_params = [{transform_indices = @transform_0, window_bounds = array<i64: 128, 128>}, {transform_indices = @transform_1, window_bounds = array<i64: 128, 128>}, {pipeline_mode = #tpu.pipeline_mode<synchronous>, transform_indices = @transform_2, window_bounds = array<i64: 1, 128>}, {transform_indices = @transform_3, window_bounds = array<i64: 128, 128>}]} {
    %c0_i32 = arith.constant 0 : i32
    %0 = arith.cmpi eq, %arg1, %c0_i32 : i32
    %1 = arith.extui %0 : i1 to i32
    %c0_i32_0 = arith.constant 0 : i32
    %2 = arith.cmpi ne, %1, %c0_i32_0 : i32
    scf.if %2 {
      %cst_10 = arith.constant 0.000000e+00 : f32
      %12 = vector.broadcast %cst_10 : f32 to vector<128x128xf32>
      %c0_11 = arith.constant 0 : index
      %c0_12 = arith.constant 0 : index
      %13 = vector.load %arg6[%c0_11, %c0_12] : memref<128x128xf32, #tpu.memory_space<vmem>>, vector<128x128xf32>
      tpu.vector_store %arg6[%c0_11, %c0_12], %12 {strides = array<i32>} : memref<128x128xf32, #tpu.memory_space<vmem>>, vector<128x128xf32>,
    } else {
    }
    %c0 = arith.constant 0 : index
    %c0_1 = arith.constant 0 : index
    %3 = vector.load %arg6[%c0, %c0_1] : memref<128x128xf32, #tpu.memory_space<vmem>>, vector<128x128xf32>
    %c0_2 = arith.constant 0 : index
    %c0_3 = arith.constant 0 : index
    %4 = vector.load %arg2[%c0_2, %c0_3] : memref<128x128xbf16, #tpu.memory_space<vmem>>, vector<128x128xbf16>
    %c0_4 = arith.constant 0 : index
    %c0_5 = arith.constant 0 : index
    %5 = vector.load %arg3[%c0_4, %c0_5] : memref<128x128xbf16, #tpu.memory_space<vmem>>, vector<128x128xbf16>
    %cst = arith.constant dense<0.000000e+00> : vector<128x128xf32>
    %6 = tpu.matmul %4, %5, %cst {dimension_numbers = #tpu.dot_dimension_numbers<[1], [0], [0], [1], [0, 0, 1, 1], [], []>} : vector<128x128xbf16>, vector<128x128xbf16>, vector<128x128xf32> -> vector<128x128xf32>
    %7 = arith.addf %3, %6 : vector<128x128xf32>
    %c0_6 = arith.constant 0 : index
    %c0_7 = arith.constant 0 : index
    %8 = vector.load %arg6[%c0_6, %c0_7] : memref<128x128xf32, #tpu.memory_space<vmem>>, vector<128x128xf32>
    tpu.vector_store %arg6[%c0_6, %c0_7], %7 {strides = array<i32>} : memref<128x128xf32, #tpu.memory_space<vmem>>, vector<128x128xf32>,
    %c0_i32_8 = arith.constant 0 : i32
    %9 = arith.cmpi eq, %arg1, %c0_i32_8 : i32
    %10 = arith.extui %9 : i1 to i32
    %c0_i32_9 = arith.constant 0 : i32
    %11 = arith.cmpi ne, %10, %c0_i32_9 : i32
    scf.if %11 {
      %c0_10 = arith.constant 0 : index
      %c0_11 = arith.constant 0 : index
      %12 = vector.load %arg6[%c0_10, %c0_11] : memref<128x128xf32, #tpu.memory_space<vmem>>, vector<128x128xf32>
      %c0_12 = arith.constant 0 : index
      %c0_13 = arith.constant 0 : index
      %13 = vector.load %arg4[%c0_12, %c0_13] : memref<1x128xf32, #tpu.memory_space<vmem>>, vector<1x128xf32>
      %14 = vector.broadcast %13 : vector<1x128xf32> to vector<128x128xf32>
      %15 = arith.addf %12, %14 : vector<128x128xf32>
      %cst_14 = arith.constant 0.000000e+00 : f32
      %16 = vector.broadcast %cst_14 : f32 to vector<128x128xf32>
      %17 = arith.maximumf %15, %16 : vector<128x128xf32>
      %18 = arith.truncf %17 : vector<128x128xf32> to vector<128x128xbf16>
      %c0_15 = arith.constant 0 : index
      %c0_16 = arith.constant 0 : index
      %19 = vector.load %arg5[%c0_15, %c0_16] : memref<128x128xbf16, #tpu.memory_space<vmem>>, vector<128x128xbf16>
      tpu.vector_store %arg5[%c0_15, %c0_16], %18 {strides = array<i32>} : memref<128x128xbf16, #tpu.memory_space<vmem>>, vector<128x128xbf16>,
    } else {
    }
    return
  }
  func.func @transform_0(%arg0: i32, %arg1: i32) -> (i32, i32) {
    %c0_i32 = arith.constant 0 : i32
    return %arg0, %arg1 : i32, i32
  }
  func.func @transform_1(%arg0: i32, %arg1: i32) -> (i32, i32) {
    %c0_i32 = arith.constant 0 : i32
    %c0_i32_0 = arith.constant 0 : i32
    return %arg1, %c0_i32 : i32, i32
  }
  func.func @transform_2(%arg0: i32, %arg1: i32) -> (i32, i32) {
    %c0_i32 = arith.constant 0 : i32
    %c0_i32_0 = arith.constant 0 : i32
    %c0_i32_1 = arith.constant 0 : i32
    return %c0_i32, %c0_i32_0 : i32, i32
  }
  func.func @transform_3(%arg0: i32, %arg1: i32) -> (i32, i32) {
    %c0_i32 = arith.constant 0 : i32
    %c0_i32_0 = arith.constant 0 : i32
    return %arg0, %c0_i32 : i32, i32
  }
}

module attributes {stable_mosaic.version = 11 : i64} {
  func.func @_ahat_kernel(%arg0: i32, %arg1: i32, %arg2: memref<128x128xbf16, #tpu.memory_space<vmem>>, %arg3: memref<128x128xbf16, #tpu.memory_space<vmem>>, %arg4: memref<128x128xf32, #tpu.memory_space<vmem>>) attributes {dimension_semantics = [#tpu.dimension_semantics<parallel>, #tpu.dimension_semantics<parallel>], iteration_bounds = array<i64: 1, 1>, scalar_prefetch = 0 : i64, scratch_operands = 0 : i64, tpu.core_type = #tpu.core_type<tc>, window_params = [{transform_indices = @transform_0, window_bounds = array<i64: 128, 128>}, {transform_indices = @transform_1, window_bounds = array<i64: 128, 128>}, {transform_indices = @transform_2, window_bounds = array<i64: 128, 128>}]} {
    %c0 = arith.constant 0 : index
    %c0_0 = arith.constant 0 : index
    %0 = vector.load %arg2[%c0, %c0_0] : memref<128x128xbf16, #tpu.memory_space<vmem>>, vector<128x128xbf16>
    %c0_1 = arith.constant 0 : index
    %c0_2 = arith.constant 0 : index
    %1 = vector.load %arg3[%c0_1, %c0_2] : memref<128x128xbf16, #tpu.memory_space<vmem>>, vector<128x128xbf16>
    %cst = arith.constant dense<0.000000e+00> : vector<128x128xf32>
    %2 = tpu.matmul %0, %1, %cst {dimension_numbers = #tpu.dot_dimension_numbers<[1], [1], [0], [0], [0, 0, 1, 0], [], []>} : vector<128x128xbf16>, vector<128x128xbf16>, vector<128x128xf32> -> vector<128x128xf32>
    %c0_3 = arith.constant 0 : index
    %c0_4 = arith.constant 0 : index
    %3 = vector.load %arg4[%c0_3, %c0_4] : memref<128x128xf32, #tpu.memory_space<vmem>>, vector<128x128xf32>
    tpu.vector_store %arg4[%c0_3, %c0_4], %2 {strides = array<i32>} : memref<128x128xf32, #tpu.memory_space<vmem>>, vector<128x128xf32>,
    return
  }
  func.func @transform_0(%arg0: i32, %arg1: i32) -> (i32, i32) {
    %c0_i32 = arith.constant 0 : i32
    %c0_i32_0 = arith.constant 0 : i32
    return %arg0, %c0_i32 : i32, i32
  }
  func.func @transform_1(%arg0: i32, %arg1: i32) -> (i32, i32) {
    %c0_i32 = arith.constant 0 : i32
    %c0_i32_0 = arith.constant 0 : i32
    return %arg1, %c0_i32 : i32, i32
  }
  func.func @transform_2(%arg0: i32, %arg1: i32) -> (i32, i32) {
    %c0_i32 = arith.constant 0 : i32
    return %arg0, %arg1 : i32, i32
  }
}

</mosaic_0001>

<bundles_post_ra>
// kernel: structure_decoder_forward.3
= control target key start
LH: loop header
LB: loop body
LE: loop exit
PB: predicated region body
PF: predicated region fallthrough
CT: control target
= control target key end

     0   :  { %s464_s1 = inlined_call_operand.vmem [shape: bf16[128,128], index: 1, kind: input, shape index: {}, may-alias: {0,1}]   ;;  %s465_s0 = inlined_call_operand.vmem [shape: bf16[128,128], index: 0, kind: input, shape index: {}, may-alias: {0,1}]   ;;  %s466_s2 = inlined_call_operand.vmem [shape: f32[128,128], index: 2, kind: output, shape index: {}]  }
   0x1   :  { %v337_v0 = vld [vmem:[%s464_s1 + $0x38] sm:$0xff]   ;;  %v338_v1 = vld [vmem:[%s464_s1 + $0x30] sm:$0xff]   ;;  %v339_v2 = vld [vmem:[%s464_s1 + $0x28] sm:$0xff]  }
   0x2   :  { %289 = vmatprep.subr.bf16.mxu0 %v337_v0  ;;  %321 = vmatprep.subr.bf16.mxu1 %v337_v0  ;;  %v345_v3 = vld [vmem:[%s465_s0] sm:$0xff]   ;;  %v341_v6 = vld [vmem:[%s464_s1 + $0x18] sm:$0xff]   ;;  %v342_v7 = vld [vmem:[%s464_s1 + $0x10] sm:$0xff]  }
   0x3   :  { %290 = vmatpush3.bf16.xpose.msra.mxu0 %v337_v0  ;;  %329 = vmatpush3.bf16.xpose.msra.mxu1 %v337_v0  ;;  %v346_v4 = vld [vmem:[%s465_s0 + $0x20] sm:$0xff]   ;;  %v343_v8 = vld [vmem:[%s464_s1 + $0x8] sm:$0xff]   ;;  %v349_v12 = vld [vmem:[%s465_s0 + $0x10] sm:$0xff]  }
   0x4   :  { %291 = vmatprep.subr.bf16.mxu0 %v338_v1  ;;  %322 = vmatprep.subr.bf16.mxu1 %v338_v1  ;;  %v340_v5 = vld [vmem:[%s464_s1 + $0x20] sm:$0xff]   ;;  %v347_v10 = vld [vmem:[%s465_s0 + $0x8] sm:$0xff]   ;;  %v350_v13 = vld [vmem:[%s465_s0 + $0x30] sm:$0xff]  }
   0x5   :  { %305 = vmatprep.mubr.bf16.mxu0 %v345_v3  ;;  %313 = vmatprep.mubr.bf16.mxu1 %v346_v4  ;;  %v344_v9 = vld [vmem:[%s464_s1] sm:$0xff]   ;;  %v348_v11 = vld [vmem:[%s465_s0 + $0x28] sm:$0xff]   ;;  %v351_v14 = vld [vmem:[%s465_s0 + $0x18] sm:$0xff]  }
   0x6   :  { %v352_v15 = vld [vmem:[%s465_s0 + $0x38] sm:$0xff]  }
   0xb   :  { %292 = vmatpush3.bf16.xpose.msra.mxu0 %v338_v1  ;;  %330 = vmatpush3.bf16.xpose.msra.mxu1 %v338_v1 }
   0xc   :  { %293 = vmatprep.subr.bf16.mxu0 %v339_v2  ;;  %323 = vmatprep.subr.bf16.mxu1 %v339_v2 }
  0x13   :  { %294 = vmatpush3.bf16.xpose.msra.mxu0 %v339_v2  ;;  %331 = vmatpush3.bf16.xpose.msra.mxu1 %v339_v2 }
  0x14   :  { %295 = vmatprep.subr.bf16.mxu0 %v340_v5  ;;  %324 = vmatprep.subr.bf16.mxu1 %v340_v5 }
  0x1b   :  { %296 = vmatpush3.bf16.xpose.msra.mxu0 %v340_v5  ;;  %332 = vmatpush3.bf16.xpose.msra.mxu1 %v340_v5 }
  0x1c   :  { %297 = vmatprep.subr.bf16.mxu0 %v341_v6  ;;  %325 = vmatprep.subr.bf16.mxu1 %v341_v6 }
  0x23   :  { %298 = vmatpush3.bf16.xpose.msra.mxu0 %v341_v6  ;;  %333 = vmatpush3.bf16.xpose.msra.mxu1 %v341_v6 }
  0x24   :  { %299 = vmatprep.subr.bf16.mxu0 %v342_v7  ;;  %326 = vmatprep.subr.bf16.mxu1 %v342_v7 }
  0x2b   :  { %300 = vmatpush3.bf16.xpose.msra.mxu0 %v342_v7  ;;  %334 = vmatpush3.bf16.xpose.msra.mxu1 %v342_v7 }
  0x2c   :  { %301 = vmatprep.subr.bf16.mxu0 %v343_v8  ;;  %327 = vmatprep.subr.bf16.mxu1 %v343_v8 }
  0x33   :  { %302 = vmatpush3.bf16.xpose.msra.mxu0 %v343_v8  ;;  %335 = vmatpush3.bf16.xpose.msra.mxu1 %v343_v8 }
  0x34   :  { %303 = vmatprep.subr.bf16.mxu0 %v344_v9  ;;  %328 = vmatprep.subr.bf16.mxu1 %v344_v9 }
  0x3b   :  { %304 = vmatpush3.bf16.xpose.msra.mxu0 %v344_v9  ;;  %336 = vmatpush3.bf16.xpose.msra.mxu1 %v344_v9 }
  0x42   :  { %306 = vmatmul.mubr.bf16.vlgmr.msra.gmra.mxu0 %v347_v10  ;;  %314 = vmatmul.mubr.bf16.vlgmr.msra.gmra.mxu1 %v348_v11 }
  0x43   :  { %309 = vmatprep.mubr.bf16.mxu0 %v349_v12  ;;  %317 = vmatprep.mubr.bf16.mxu1 %v350_v13 }
  0x4a   :  { %310 = vmatmul.mubr.bf16.gmra.mxu0 %v351_v14  ;;  %318 = vmatmul.mubr.bf16.gmra.mxu1 %v352_v15 }
 0x102   :  { %v307_v16 = vpop.f32.mrf.mxu0  ;;  %v315_v17 = vpop.f32.mrf.mxu1 }
 0x103   :  { %239 = vst [vmem:[%s466_s2 + $0x10] sm:$0xff] %v307_v16  ;;  %247 = vst [vmem:[%s466_s2 + $0x50] sm:$0xff] %v315_v17 }
 0x104   :  { %v174_v18 = vpop.f32.mrf.mxu0  ;;  %v206_v19 = vpop.f32.mrf.mxu1 }
 0x105   :  { %237 = vst [vmem:[%s466_s2] sm:$0xff] %v174_v18  ;;  %245 = vst [vmem:[%s466_s2 + $0x40] sm:$0xff] %v206_v19 }
 0x106   :  { %v308_v20 = vpop.f32.mrf.mxu0  ;;  %v316_v21 = vpop.f32.mrf.mxu1 }
 0x107   :  { %240 = vst [vmem:[%s466_s2 + $0x18] sm:$0xff] %v308_v20  ;;  %248 = vst [vmem:[%s466_s2 + $0x58] sm:$0xff] %v316_v21 }
 0x108   :  { %v177_v22 = vpop.f32.mrf.mxu0  ;;  %v209_v23 = vpop.f32.mrf.mxu1 }
 0x109   :  { %238 = vst [vmem:[%s466_s2 + $0x8] sm:$0xff] %v177_v22  ;;  %246 = vst [vmem:[%s466_s2 + $0x48] sm:$0xff] %v209_v23 }
 0x10a   :  { %v311_v24 = vpop.f32.mrf.mxu0  ;;  %v319_v25 = vpop.f32.mrf.mxu1 }
 0x10b   :  { %243 = vst [vmem:[%s466_s2 + $0x30] sm:$0xff] %v311_v24  ;;  %251 = vst [vmem:[%s466_s2 + $0x70] sm:$0xff] %v319_v25 }
 0x10c   :  { %v190_v26 = vpop.f32.mrf.mxu0  ;;  %v222_v27 = vpop.f32.mrf.mxu1 }
 0x10d   :  { %241 = vst [vmem:[%s466_s2 + $0x20] sm:$0xff] %v190_v26  ;;  %249 = vst [vmem:[%s466_s2 + $0x60] sm:$0xff] %v222_v27 }
 0x10e   :  { %v312_v28 = vpop.f32.mrf.mxu0  ;;  %v320_v29 = vpop.f32.mrf.mxu1 }
 0x10f   :  { %244 = vst [vmem:[%s466_s2 + $0x38] sm:$0xff] %v312_v28  ;;  %252 = vst [vmem:[%s466_s2 + $0x78] sm:$0xff] %v320_v29 }
 0x110   :  { %v193_v30 = vpop.f32.mrf.mxu0  ;;  %v225_v31 = vpop.f32.mrf.mxu1 }
 0x111   :  { %242 = vst [vmem:[%s466_s2 + $0x28] sm:$0xff] %v193_v30  ;;  %250 = vst [vmem:[%s466_s2 + $0x68] sm:$0xff] %v225_v31 }

// kernel: structure_decoder_forward.2
= control target key start
LH: loop header
LB: loop body
LE: loop exit
PB: predicated region body
PF: predicated region fallthrough
CT: control target
= control target key end

     0   :  { %s721_s1 = inlined_call_operand.vmem [shape: bf16[128,128], index: 1, kind: input, shape index: {}]   ;;  %s722_s0 = inlined_call_operand.vmem [shape: bf16[128,128], index: 0, kind: input, shape index: {}]   ;;  %s723_s2 = inlined_call_operand.vmem [shape: f32[1,128], index: 2, kind: input, shape index: {}]   ;;  %s724_s3 = inlined_call_operand.vmem [shape: bf16[128,128], index: 3, kind: output, shape index: {}]  }
   0x1   :  { %v610_v0 = vld [vmem:[%s721_s1 + $0x38] sm:$0xff]   ;;  %v611_v1 = vld [vmem:[%s721_s1 + $0x30] sm:$0xff]   ;;  %v612_v2 = vld [vmem:[%s721_s1 + $0x28] sm:$0xff]  }
   0x2   :  { %562 = vmatprep.subr.bf16.mxu0 %v610_v0  ;;  %594 = vmatprep.subr.bf16.mxu1 %v610_v0  ;;  %v613_v3 = vld [vmem:[%s721_s1 + $0x20] sm:$0xff]   ;;  %v614_v6 = vld [vmem:[%s721_s1 + $0x18] sm:$0xff]   ;;  %v615_v7 = vld [vmem:[%s721_s1 + $0x10] sm:$0xff]  }
   0x3   :  { %563 = vmatpush3.bf16.msra.mxu0 %v610_v0  ;;  %602 = vmatpush3.bf16.msra.mxu1 %v610_v0  ;;  %v618_v4 = vld [vmem:[%s722_s0] sm:$0xff]   ;;  %v616_v8 = vld [vmem:[%s721_s1 + $0x8] sm:$0xff]   ;;  %v622_v12 = vld [vmem:[%s722_s0 + $0x10] sm:$0xff]  }
   0x4   :  { %564 = vmatprep.subr.bf16.mxu0 %v611_v1  ;;  %595 = vmatprep.subr.bf16.mxu1 %v611_v1  ;;  %v619_v5 = vld [vmem:[%s722_s0 + $0x20] sm:$0xff]   ;;  %v620_v10 = vld [vmem:[%s722_s0 + $0x8] sm:$0xff]   ;;  %v623_v13 = vld [vmem:[%s722_s0 + $0x30] sm:$0xff]  }
   0x5   :  { %578 = vmatprep.mubr.bf16.mxu0 %v618_v4  ;;  %586 = vmatprep.mubr.bf16.mxu1 %v619_v5  ;;  %v617_v9 = vld [vmem:[%s721_s1] sm:$0xff]   ;;  %v621_v11 = vld [vmem:[%s722_s0 + $0x28] sm:$0xff]   ;;  %v624_v14 = vld [vmem:[%s722_s0 + $0x18] sm:$0xff]  }
   0x6   :  { %v625_v15 = vld [vmem:[%s722_s0 + $0x38] sm:$0xff]   ;;  %v466_v16 = vld [vmem:[%s723_s2] ss:$0 sm:$0xff] }
   0x7   :  { %565 = vmatpush3.bf16.msra.mxu0 %v611_v1  ;;  %603 = vmatpush3.bf16.msra.mxu1 %v611_v1 }
   0x8   :  { %566 = vmatprep.subr.bf16.mxu0 %v612_v2  ;;  %596 = vmatprep.subr.bf16.mxu1 %v612_v2 }
   0xb   :  { %567 = vmatpush3.bf16.msra.mxu0 %v612_v2  ;;  %604 = vmatpush3.bf16.msra.mxu1 %v612_v2 }
   0xc   :  { %568 = vmatprep.subr.bf16.mxu0 %v613_v3  ;;  %597 = vmatprep.subr.bf16.mxu1 %v613_v3 }
   0xf   :  { %569 = vmatpush3.bf16.msra.mxu0 %v613_v3  ;;  %605 = vmatpush3.bf16.msra.mxu1 %v613_v3 }
  0x10   :  { %570 = vmatprep.subr.bf16.mxu0 %v614_v6  ;;  %598 = vmatprep.subr.bf16.mxu1 %v614_v6 }
  0x13   :  { %571 = vmatpush3.bf16.msra.mxu0 %v614_v6  ;;  %606 = vmatpush3.bf16.msra.mxu1 %v614_v6 }
  0x14   :  { %572 = vmatprep.subr.bf16.mxu0 %v615_v7  ;;  %599 = vmatprep.subr.bf16.mxu1 %v615_v7 }
  0x17   :  { %573 = vmatpush3.bf16.msra.mxu0 %v615_v7  ;;  %607 = vmatpush3.bf16.msra.mxu1 %v615_v7 }
  0x18   :  { %574 = vmatprep.subr.bf16.mxu0 %v616_v8  ;;  %600 = vmatprep.subr.bf16.mxu1 %v616_v8 }
  0x1b   :  { %575 = vmatpush3.bf16.msra.mxu0 %v616_v8  ;;  %608 = vmatpush3.bf16.msra.mxu1 %v616_v8 }
  0x1c   :  { %576 = vmatprep.subr.bf16.mxu0 %v617_v9  ;;  %601 = vmatprep.subr.bf16.mxu1 %v617_v9 }
  0x1f   :  { %577 = vmatpush3.bf16.msra.mxu0 %v617_v9  ;;  %609 = vmatpush3.bf16.msra.mxu1 %v617_v9 }
  0x22   :  { %579 = vmatmul.mubr.bf16.vlgmr.msra.gmra.mxu0 %v620_v10  ;;  %587 = vmatmul.mubr.bf16.vlgmr.msra.gmra.mxu1 %v621_v11 }
  0x23   :  { %582 = vmatprep.mubr.bf16.mxu0 %v622_v12  ;;  %590 = vmatprep.mubr.bf16.mxu1 %v623_v13 }
  0x2a   :  { %583 = vmatmul.mubr.bf16.gmra.mxu0 %v624_v14  ;;  %591 = vmatmul.mubr.bf16.gmra.mxu1 %v625_v15 }
  0xe2   :  { %v580_v17 = vpop.f32.mrf.mxu0  ;;  %v588_v18 = vpop.f32.mrf.mxu1 }
  0xe3   :  { %v336_v19 = vadd.f32 %v580_v17, %v466_v16  ;;  %v344_v20 = vadd.f32 %v588_v18, %v466_v16 }
  0xe4   :  { %v213_v21 = vpop.f32.mrf.mxu0  ;;  %v245_v22 = vpop.f32.mrf.mxu1 }
  0xe5   :  { %v334_v23 = vadd.f32 %v466_v16, %v213_v21  ;;  %v342_v24 = vadd.f32 %v466_v16, %v245_v22  ;;  %v352_v29 = vmax.f32 %v336_v19, 0.0  ;;  %v360_v30 = vmax.f32 %v344_v20, 0.0 }
  0xe6   :  { %v581_v25 = vpop.f32.mrf.mxu0  ;;  %v589_v26 = vpop.f32.mrf.mxu1 }
  0xe7   :  { %v337_v27 = vadd.f32 %v581_v25, %v466_v16  ;;  %v345_v28 = vadd.f32 %v589_v26, %v466_v16  ;;  %v350_v37 = vmax.f32 %v334_v23, 0.0  ;;  %v358_v38 = vmax.f32 %v342_v24, 0.0 }
  0xe8   :  { %v216_v31 = vpop.f32.mrf.mxu0  ;;  %v248_v32 = vpop.f32.mrf.mxu1 }
  0xe9   :  { %v353_v33 = vmax.f32 %v337_v27, 0.0  ;;  %v361_v34 = vmax.f32 %v345_v28, 0.0  ;;  %v335_v35 = vadd.f32 %v466_v16, %v216_v31  ;;  %v343_v36 = vadd.f32 %v466_v16, %v248_v32 }
  0xea   :  { %v584_v39 = vpop.f32.mrf.mxu0  ;;  %v592_v40 = vpop.f32.mrf.mxu1 }
  0xeb   :  { %v507_v41 = vpack.c.bf16 %v353_v33, %v352_v29  ;;  %v527_v42 = vpack.c.bf16 %v361_v34, %v360_v30  ;;  %v351_v43 = vmax.f32 %v335_v35, 0.0  ;;  %v359_v44 = vmax.f32 %v343_v36, 0.0 }
  0xec   :  { %v340_v45 = vadd.f32 %v584_v39, %v466_v16  ;;  %v348_v46 = vadd.f32 %v592_v40, %v466_v16  ;;  %v229_v47 = vpop.f32.mrf.mxu0  ;;  %v261_v48 = vpop.f32.mrf.mxu1 }
  0xed   :  { %539 = vst [vmem:[%s724_s3 + $0x8] sm:$0xff] %v507_v41   ;;  %543 = vst [vmem:[%s724_s3 + $0x28] sm:$0xff] %v527_v42   ;;  %v502_v49 = vpack.c.bf16 %v351_v43, %v350_v37  ;;  %v522_v50 = vpack.c.bf16 %v359_v44, %v358_v38  ;;  %v338_v51 = vadd.f32 %v466_v16, %v229_v47 }
  0xee   :  { %v346_v52 = vadd.f32 %v466_v16, %v261_v48  ;;  %v585_v53 = vpop.f32.mrf.mxu0  ;;  %v593_v54 = vpop.f32.mrf.mxu1  ;;  %v356_v57 = vmax.f32 %v340_v45, 0.0  ;;  %v364_v58 = vmax.f32 %v348_v46, 0.0 }
  0xef   :  { %503 = vst [vmem:[%s724_s3] sm:$0xff] %v502_v49   ;;  %542 = vst [vmem:[%s724_s3 + $0x20] sm:$0xff] %v522_v50   ;;  %v341_v55 = vadd.f32 %v585_v53, %v466_v16  ;;  %v349_v56 = vadd.f32 %v593_v54, %v466_v16  ;;  %v354_v1 = vmax.f32 %v338_v51, 0.0 }
  0xf0   :  { %v232_v59 = vpop.f32.mrf.mxu0  ;;  %v264_v60 = vpop.f32.mrf.mxu1  ;;  %v362_v2 = vmax.f32 %v346_v52, 0.0 }
  0xf1   :  { %v357_v61 = vmax.f32 %v341_v55, 0.0  ;;  %v365_v62 = vmax.f32 %v349_v56, 0.0  ;;  %v339_v63 = vadd.f32 %v466_v16, %v232_v59  ;;  %v347_v0 = vadd.f32 %v466_v16, %v264_v60 }
  0xf3   :  { %v517_v3 = vpack.c.bf16 %v357_v61, %v356_v57  ;;  %v537_v4 = vpack.c.bf16 %v365_v62, %v364_v58  ;;  %v355_v5 = vmax.f32 %v339_v63, 0.0  ;;  %v363_v6 = vmax.f32 %v347_v0, 0.0 }
  0xf5   :  { %541 = vst [vmem:[%s724_s3 + $0x18] sm:$0xff] %v517_v3   ;;  %545 = vst [vmem:[%s724_s3 + $0x38] sm:$0xff] %v537_v4   ;;  %v512_v7 = vpack.c.bf16 %v355_v5, %v354_v1  ;;  %v532_v8 = vpack.c.bf16 %v363_v6, %v362_v2 }
  0xf7   :  { %540 = vst [vmem:[%s724_s3 + $0x10] sm:$0xff] %v512_v7   ;;  %544 = vst [vmem:[%s724_s3 + $0x30] sm:$0xff] %v532_v8  }

</bundles_post_ra>
